<compile_context>
chip_gen: v7x
topology: tpu7x:2x2x1
jax: 0.10.0
libtpu: 0.0.40
codegen_flags: <defaults>
</compile_context>

<pallas_src>
import functools

import jax
import jax.numpy as jnp
from jax.experimental import pallas as pl
from jax.experimental.pallas import tpu as pltpu

H_PAD = 128  # hidden widths (8, 8, 1) zero-padded to one full lane group


def mlp_kernel(mxu_dtype, x_ref, w1_ref, b1_ref, w2_ref, b2_ref, w3_ref, b3_ref, o_ref):
    x = x_ref[...].astype(mxu_dtype)                                  # [TB, 784]
    h1 = jnp.dot(x, w1_ref[...], preferred_element_type=jnp.float32)  # MXU, f32 acc
    h1 = jnp.maximum(h1 + b1_ref[...], 0.0)                           # [TB, 128] f32
    h2 = jnp.dot(h1.astype(mxu_dtype), w2_ref[...],
                 preferred_element_type=jnp.float32)
    h2 = jnp.maximum(h2 + b2_ref[...], 0.0)                           # [TB, 128] f32
    # Final 128 -> 1 layer with w3 supplied as a (128, 1) column: natural MXU
    # layout (K on LHS lanes / RHS sublanes), no transpose of the h2 tile.
    z = jnp.dot(h2.astype(mxu_dtype), w3_ref[...],
                preferred_element_type=jnp.float32)                   # [TB, 1]
    o_ref[...] = jax.nn.sigmoid(z + b3_ref[0])


def _round_up(n, m):
    return (n + m - 1) // m * m


def _device_tile_defaults():
    """(tile_b cap in rows, minimum number of batch tiles) for the local chip."""
    try:
        kind = jax.devices()[0].device_kind.lower()
    except Exception:
        kind = ""
    if "v7" in kind:
        return 2048, 2   # fast HBM: amortize per-step overhead; 2 TCs -> >=2 tiles
    if "v6" in kind:
        return 2048, 1   # 32 MiB scoped VMEM: 2x7.0 MiB x bufs + out + weights fits
    return 1024, 1       # v5e / unknown: stay under the 16 MiB default scoped VMEM


def _pick_tile_b(b_pad128, cap_rows, min_tiles):
    """Largest 128-multiple tile that divides the padded batch (no padding waste),
    is <= cap_rows, and (when possible) yields >= min_tiles tiles."""
    m = b_pad128 // 128
    cap = max(1, cap_rows // 128)
    best = 0
    for d in range(1, min(m, cap) + 1):
        if m % d == 0 and (m // d) >= min_tiles:
            best = d
    if best == 0:  # min_tiles unsatisfiable (e.g. single 128-row group)
        for d in range(1, min(m, cap) + 1):
            if m % d == 0:
                best = d
    return best * 128


def neural_net_forward(x, w1, b1, w2, b2, w3, b3, *, tile_b=None, mxu_bf16=True):
    """x: [B, 784] f32; weights stored as (in, out); biases as (1, out)."""
    B, F = x.shape
    assert F == w1.shape[0]
    h1w, h2w = w1.shape[1], w2.shape[1]

    b_pad = _round_up(B, 128)
    if tile_b is None:
        cap_rows, min_tiles = _device_tile_defaults()
        tile_b = _pick_tile_b(b_pad, cap_rows, min_tiles)
    assert tile_b % 128 == 0, "tile_b must be a multiple of 128"
    b_pad = _round_up(b_pad, tile_b)

    if b_pad != B:
        x = jnp.pad(x, ((0, b_pad - B), (0, 0)))
    n_tiles = b_pad // tile_b

    f32 = jnp.float32
    mxu_dt = jnp.bfloat16 if mxu_bf16 else f32
    x = x.astype(f32)
    # Zero-pad narrow layers to 128 lanes (exact: 0-weights add 0 and ReLU(0)=0).
    # Weights are stored in the MXU dtype so the resident VMEM copies are bf16.
    w1p = jnp.zeros((F, H_PAD), f32).at[:, :h1w].set(w1.astype(f32)).astype(mxu_dt)
    b1p = jnp.zeros((1, H_PAD), f32).at[:, :h1w].set(b1.reshape(1, -1).astype(f32))
    w2p = jnp.zeros((H_PAD, H_PAD), f32).at[:h1w, :h2w].set(w2.astype(f32)).astype(mxu_dt)
    b2p = jnp.zeros((1, H_PAD), f32).at[:, :h2w].set(b2.reshape(1, -1).astype(f32))
    w3p = jnp.zeros((H_PAD, 1), f32).at[:h2w, :].set(
        w3.astype(f32).reshape(-1, 1)).astype(mxu_dt)
    b3p = jnp.asarray(b3, f32).reshape((1,))

    wbytes = 2 if mxu_bf16 else 4
    cost = pl.CostEstimate(
        flops=2 * b_pad * (F * H_PAD + H_PAD * H_PAD + H_PAD),
        transcendentals=b_pad,  # sigmoid
        bytes_accessed=b_pad * F * 4 + b_pad * 4
        + (F * H_PAD + H_PAD * H_PAD + H_PAD) * wbytes + 2 * H_PAD * 4 + 4,
    )

    const = lambda i: (0, 0)  # resident operands: DMA'd once, reused every tile
    out = pl.pallas_call(
        functools.partial(mlp_kernel, mxu_dt),
        out_shape=jax.ShapeDtypeStruct((b_pad, 1), f32),
        grid=(n_tiles,),
        in_specs=[
            pl.BlockSpec((tile_b, F), lambda i: (i, 0)),        # x: streamed per tile
            pl.BlockSpec((F, H_PAD), const),                    # W1 (resident)
            pl.BlockSpec((1, H_PAD), const),                    # b1
            pl.BlockSpec((H_PAD, H_PAD), const),                # W2
            pl.BlockSpec((1, H_PAD), const),                    # b2
            pl.BlockSpec((H_PAD, 1), const),                    # W3 (as a column)
            pl.BlockSpec(memory_space=pltpu.MemorySpace.SMEM),  # b3 scalar
        ],
        out_specs=pl.BlockSpec((tile_b, 1), lambda i: (i, 0)),
        compiler_params=pltpu.CompilerParams(
            dimension_semantics=("parallel",),
        ),
        cost_estimate=cost,
    )(x, w1p, b1p, w2p, b2p, w3p, b3p)

    return out[:B]


def init_params(key):
    # Deterministic init mimicking torch.nn.Linear default: U(-1/sqrt(fan_in), ...)
    def linear(key, fan_in, fan_out):
        kw, kb = jax.random.split(key)
        bound = 1.0 / jnp.sqrt(fan_in)
        w = jax.random.uniform(kw, (fan_in, fan_out), jnp.float32, -bound, bound)
        b = jax.random.uniform(kb, (1, fan_out), jnp.float32, -bound, bound)
        return w, b

    k1, k2, k3 = jax.random.split(key, 3)
    w1, b1 = linear(k1, 28 ** 2, 8)
    w2, b2 = linear(k2, 8, 8)
    w3, b3 = linear(k3, 8, 1)
    return w1, b1, w2, b2, w3, b3


def reference_forward(x, w1, b1, w2, b2, w3, b3):
    h1 = jax.nn.relu(x @ w1 + b1)
    h2 = jax.nn.relu(h1 @ w2 + b2)
    return jax.nn.sigmoid(h2 @ w3 + b3)


if __name__ == "__main__":
    key = jax.random.PRNGKey(0)
    kx, kp = jax.random.split(key)

    # Small shapes; B chosen to exercise a multi-tile batch grid and 128-padding.
    B = 200
    x = jax.random.normal(kx, (B, 28 ** 2), jnp.float32)
    params = init_params(kp)
    ref = reference_forward(x, *params)

    # Default (bf16 MXU, f32 accumulation) path — explicit small tile -> 2 grid steps.
    out_bf16 = jax.block_until_ready(
        neural_net_forward(x, *params, tile_b=128, mxu_bf16=True))
    assert out_bf16.shape == (B, 1)
    err_bf16 = float(jnp.max(jnp.abs(out_bf16 - ref)))
    assert jnp.allclose(out_bf16, ref, atol=5e-3, rtol=1e-2), err_bf16

    # Exact f32 MXU path.
    out_f32 = jax.block_until_ready(
        neural_net_forward(x, *params, tile_b=128, mxu_bf16=False))
    err_f32 = float(jnp.max(jnp.abs(out_f32 - ref)))
    assert jnp.allclose(out_f32, ref, atol=1e-5, rtol=1e-5), err_f32

    # Auto (device-dependent) tile selection path.
    out_auto = jax.block_until_ready(neural_net_forward(x, *params))
    assert out_auto.shape == (B, 1)
    assert jnp.allclose(out_auto, ref, atol=5e-3, rtol=1e-2), float(
        jnp.max(jnp.abs(out_auto - ref)))

    print("KERNEL_OK")
</pallas_src>

<mosaic_0001>
module attributes {stable_mosaic.version = 11 : i64} {
  func.func @mlp_kernel(%arg0: i32, %arg1: memref<128x784xf32, #tpu.memory_space<vmem>>, %arg2: memref<784x128xbf16, #tpu.memory_space<vmem>>, %arg3: memref<1x128xf32, #tpu.memory_space<vmem>>, %arg4: memref<128x128xbf16, #tpu.memory_space<vmem>>, %arg5: memref<1x128xf32, #tpu.memory_space<vmem>>, %arg6: memref<128x1xbf16, #tpu.memory_space<vmem>>, %arg7: memref<1xf32, #tpu.memory_space<smem>>, %arg8: memref<128x1xf32, #tpu.memory_space<vmem>>) attributes {dimension_semantics = [#tpu.dimension_semantics<parallel>], iteration_bounds = array<i64: 2>, scalar_prefetch = 0 : i64, scratch_operands = 0 : i64, tpu.core_type = #tpu.core_type<tc>, window_params = [{transform_indices = @transform_0, window_bounds = array<i64: 128, 784>}, {pipeline_mode = #tpu.pipeline_mode<synchronous>, transform_indices = @transform_1, window_bounds = array<i64: 784, 128>}, {pipeline_mode = #tpu.pipeline_mode<synchronous>, transform_indices = @transform_2, window_bounds = array<i64: 1, 128>}, {pipeline_mode = #tpu.pipeline_mode<synchronous>, transform_indices = @transform_3, window_bounds = array<i64: 128, 128>}, {pipeline_mode = #tpu.pipeline_mode<synchronous>, transform_indices = @transform_4, window_bounds = array<i64: 1, 128>}, {pipeline_mode = #tpu.pipeline_mode<synchronous>, transform_indices = @transform_5, window_bounds = array<i64: 128, 1>}, {transform_indices = @transform_6, window_bounds = array<i64: 1>}, {transform_indices = @transform_7, window_bounds = array<i64: 128, 1>}]} {
    %c0 = arith.constant 0 : index
    %c0_0 = arith.constant 0 : index
    %0 = vector.load %arg1[%c0, %c0_0] : memref<128x784xf32, #tpu.memory_space<vmem>>, vector<128x784xf32>
    %1 = arith.truncf %0 : vector<128x784xf32> to vector<128x784xbf16>
    %c0_1 = arith.constant 0 : index
    %c0_2 = arith.constant 0 : index
    %2 = vector.load %arg2[%c0_1, %c0_2] : memref<784x128xbf16, #tpu.memory_space<vmem>>, vector<784x128xbf16>
    %cst = arith.constant dense<0.000000e+00> : vector<128x128xf32>
    %3 = tpu.matmul %1, %2, %cst {dimension_numbers = #tpu.dot_dimension_numbers<[1], [0], [0], [1], [0, 0, 1, 1], [], []>} : vector<128x784xbf16>, vector<784x128xbf16>, vector<128x128xf32> -> vector<128x128xf32>
    %c0_3 = arith.constant 0 : index
    %c0_4 = arith.constant 0 : index
    %4 = vector.load %arg3[%c0_3, %c0_4] : memref<1x128xf32, #tpu.memory_space<vmem>>, vector<1x128xf32>
    %5 = vector.broadcast %4 : vector<1x128xf32> to vector<128x128xf32>
    %6 = arith.addf %3, %5 : vector<128x128xf32>
    %cst_5 = arith.constant 0.000000e+00 : f32
    %7 = vector.broadcast %cst_5 : f32 to vector<128x128xf32>
    %8 = arith.maximumf %6, %7 : vector<128x128xf32>
    %9 = arith.truncf %8 : vector<128x128xf32> to vector<128x128xbf16>
    %c0_6 = arith.constant 0 : index
    %c0_7 = arith.constant 0 : index
    %10 = vector.load %arg4[%c0_6, %c0_7] : memref<128x128xbf16, #tpu.memory_space<vmem>>, vector<128x128xbf16>
    %cst_8 = arith.constant dense<0.000000e+00> : vector<128x128xf32>
    %11 = tpu.matmul %9, %10, %cst_8 {dimension_numbers = #tpu.dot_dimension_numbers<[1], [0], [0], [1], [0, 0, 1, 1], [], []>} : vector<128x128xbf16>, vector<128x128xbf16>, vector<128x128xf32> -> vector<128x128xf32>
    %c0_9 = arith.constant 0 : index
    %c0_10 = arith.constant 0 : index
    %12 = vector.load %arg5[%c0_9, %c0_10] : memref<1x128xf32, #tpu.memory_space<vmem>>, vector<1x128xf32>
    %13 = vector.broadcast %12 : vector<1x128xf32> to vector<128x128xf32>
    %14 = arith.addf %11, %13 : vector<128x128xf32>
    %cst_11 = arith.constant 0.000000e+00 : f32
    %15 = vector.broadcast %cst_11 : f32 to vector<128x128xf32>
    %16 = arith.maximumf %14, %15 : vector<128x128xf32>
    %17 = arith.truncf %16 : vector<128x128xf32> to vector<128x128xbf16>
    %c0_12 = arith.constant 0 : index
    %c0_13 = arith.constant 0 : index
    %18 = vector.load %arg6[%c0_12, %c0_13] : memref<128x1xbf16, #tpu.memory_space<vmem>>, vector<128x1xbf16>
    %cst_14 = arith.constant dense<0.000000e+00> : vector<128x1xf32>
    %19 = tpu.matmul %17, %18, %cst_14 {dimension_numbers = #tpu.dot_dimension_numbers<[1], [0], [0], [1], [0, 0, 1, 1], [], []>} : vector<128x128xbf16>, vector<128x1xbf16>, vector<128x1xf32> -> vector<128x1xf32>
    %c0_15 = arith.constant 0 : index
    %20 = memref.load %arg7[%c0_15] : memref<1xf32, #tpu.memory_space<smem>>
    %21 = vector.broadcast %20 : f32 to vector<128x1xf32>
    %22 = arith.addf %19, %21 : vector<128x1xf32>
    %23 = arith.negf %22 : vector<128x1xf32>
    %24 = math.exp %23 : vector<128x1xf32>
    %cst_16 = arith.constant 1.000000e+00 : f32
    %25 = vector.broadcast %cst_16 : f32 to vector<128x1xf32>
    %26 = arith.addf %25, %24 : vector<128x1xf32>
    %27 = arith.divf %25, %26 : vector<128x1xf32>
    %c0_17 = arith.constant 0 : index
    %c0_18 = arith.constant 0 : index
    %28 = vector.load %arg8[%c0_17, %c0_18] : memref<128x1xf32, #tpu.memory_space<vmem>>, vector<128x1xf32>
    tpu.vector_store %arg8[%c0_17, %c0_18], %27 {strides = array<i32>} : memref<128x1xf32, #tpu.memory_space<vmem>>, vector<128x1xf32>,
    return
  }
  func.func @transform_0(%arg0: i32) -> (i32, i32) {
    %c0_i32 = arith.constant 0 : i32
    %c0_i32_0 = arith.constant 0 : i32
    return %arg0, %c0_i32 : i32, i32
  }
  func.func @transform_1(%arg0: i32) -> (i32, i32) {
    %c0_i32 = arith.constant 0 : i32
    %c0_i32_0 = arith.constant 0 : i32
    %c0_i32_1 = arith.constant 0 : i32
    return %c0_i32, %c0_i32_0 : i32, i32
  }
  func.func @transform_2(%arg0: i32) -> (i32, i32) {
    %c0_i32 = arith.constant 0 : i32
    %c0_i32_0 = arith.constant 0 : i32
    %c0_i32_1 = arith.constant 0 : i32
    return %c0_i32, %c0_i32_0 : i32, i32
  }
  func.func @transform_3(%arg0: i32) -> (i32, i32) {
    %c0_i32 = arith.constant 0 : i32
    %c0_i32_0 = arith.constant 0 : i32
    %c0_i32_1 = arith.constant 0 : i32
    return %c0_i32, %c0_i32_0 : i32, i32
  }
  func.func @transform_4(%arg0: i32) -> (i32, i32) {
    %c0_i32 = arith.constant 0 : i32
    %c0_i32_0 = arith.constant 0 : i32
    %c0_i32_1 = arith.constant 0 : i32
    return %c0_i32, %c0_i32_0 : i32, i32
  }
  func.func @transform_5(%arg0: i32) -> (i32, i32) {
    %c0_i32 = arith.constant 0 : i32
    %c0_i32_0 = arith.constant 0 : i32
    %c0_i32_1 = arith.constant 0 : i32
    return %c0_i32, %c0_i32_0 : i32, i32
  }
  func.func @transform_6(%arg0: i32) -> i32 {
    %c0_i32 = arith.constant 0 : i32
    %c0_i32_0 = arith.constant 0 : i32
    return %c0_i32 : i32
  }
  func.func @transform_7(%arg0: i32) -> (i32, i32) {
    %c0_i32 = arith.constant 0 : i32
    %c0_i32_0 = arith.constant 0 : i32
    return %arg0, %c0_i32 : i32, i32
  }
}

</mosaic_0001>

<bundles_post_ra>
// kernel: tpu_custom_call.1
= control target key start
LH: loop header
LB: loop body
LE: loop exit
PB: predicated region body
PF: predicated region fallthrough
CT: control target
= control target key end

     0   :  { %s2437_s26 = smov 0   ;;  %s2901_s0 = inlined_call_operand.vmem [shape: f32[256,784], index: 0, kind: input, shape index: {}]   ;;  %s2902_s1 = inlined_call_operand.vmem [shape: bf16[784,128], index: 1, kind: input, shape index: {}]   ;;  %s2903_s2 = inlined_call_operand.vmem [shape: f32[1,128], index: 2, kind: input, shape index: {}]   ;;  %s2904_s3 = inlined_call_operand.vmem [shape: bf16[128,128], index: 3, kind: input, shape index: {}]   ;;  %s2905_s4 = inlined_call_operand.vmem [shape: f32[1,128], index: 4, kind: input, shape index: {}]   ;;  %s2906_s5 = inlined_call_operand.vmem [shape: bf16[128,1], index: 5, kind: input, shape index: {}]   ;;  %s2907_s6 = inlined_call_operand.<no memory space> [shape: f32[1], index: 6, kind: input, shape index: {}]   ;;  %s2908_s7 = inlined_call_operand.vmem [shape: f32[256,1], index: 7, kind: output, shape index: {}]  }
   0x1   :  { %12 = sst [smem:[#allocation2]] %s2907_s6 }
   0x2 LB: > { %s1815_s27 = sadd.s32 4294967295, %s2392_s26   ;;  %p1819_p0 = scmp.ge.s32.totalorder %s2392_s26, 1  ;;  %s2392_s26 = sphi %s2437_s26, %s18_s26  }
   0x3   : > { %p240_p1 = scmp.lt.s32.totalorder %s2392_s26, 3 }
   0x5   : > { %p241_p2 = pnand %p1819_p0, %p240_p1 }
   0x6   : > { %v2257_v0 = vld [vmem:[%s2902_s1 + $0x40] sm:$0xff] (!%p241_p2)   ;;  %v2261_v4 = vld [vmem:[%s2902_s1 + $0x48] sm:$0xff] (!%p241_p2)   ;;  %v2265_v8 = vld [vmem:[%s2902_s1 + $0x50] sm:$0xff] (!%p241_p2)   ;;  %s1820_s12 = sshll.u32 (!%p241_p2), %s1815_s27, 4  ;;  %vm854_vm0 = vcmask (!%p241_p2), 130048   ;;  %s1499_s11 = sld [smem:[#allocation2]] (!%p241_p2) }
   0x7   : > { %244 = sbr.rel (%p241_p2) target bundleno = 843 (0x34b), region = 48  ;;  %v2258_v1 = vld [vmem:[%s2902_s1 + $0xc0] sm:$0xff] (!%p241_p2)   ;;  %1917 = vmatprep.subr.bf16.mxu0 (!%p241_p2), %v2257_v0  ;;  %v2262_v5 = vld [vmem:[%s2902_s1 + $0xc8] sm:$0xff] (!%p241_p2)   ;;  %v2266_v9 = vld [vmem:[%s2902_s1 + $0xd0] sm:$0xff] (!%p241_p2)   ;;  %p274_p3 = scmp.lt.s32.totalorder (!%p241_p2), %s1820_s12, 31  ;;  %vm1742_vm1 = vcmask (!%p241_p2), 7168  }
   0x8   : > { %v2259_v2 = vld [vmem:[%s2902_s1] sm:$0xff] (!%p241_p2)   ;;  %1981 = vmatprep.subr.bf16.mxu1 (!%p241_p2), %v2258_v1  ;;  %v2263_v6 = vld [vmem:[%s2902_s1 + $0x8] sm:$0xff] (!%p241_p2)   ;;  %v2267_v10 = vld [vmem:[%s2902_s1 + $0x10] sm:$0xff] (!%p241_p2)  }
   0x9   : > { %v2260_v3 = vld [vmem:[%s2902_s1 + $0x80] sm:$0xff] (!%p241_p2)   ;;  %1918 = vmatpush3.bf16.msra.mxu0 (!%p241_p2), %v2259_v2  ;;  %v2264_v7 = vld [vmem:[%s2902_s1 + $0x88] sm:$0xff] (!%p241_p2)   ;;  %v2268_v11 = vld [vmem:[%s2902_s1 + $0x90] sm:$0xff] (!%p241_p2)  }
   0xa   : > { %1982 = vmatpush3.bf16.msra.mxu1 (!%p241_p2), %v2260_v3  ;;  %1919 = vmatprep.subr.bf16.mxu0 (!%p241_p2), %v2261_v4  ;;  %v2269_v12 = vld [vmem:[%s2902_s1 + $0x58] sm:$0xff] (!%p241_p2)   ;;  %v2273_v16 = vld [vmem:[%s2902_s1 + $0x60] sm:$0xff] (!%p241_p2)   ;;  %v2277_v20 = vld [vmem:[%s2902_s1 + $0x68] sm:$0xff] (!%p241_p2)  }
   0xb   : > { %1983 = vmatprep.subr.bf16.mxu1 (!%p241_p2), %v2262_v5  ;;  %v2270_v13 = vld [vmem:[%s2902_s1 + $0xd8] sm:$0xff] (!%p241_p2)   ;;  %v2274_v17 = vld [vmem:[%s2902_s1 + $0xe0] sm:$0xff] (!%p241_p2)   ;;  %v2278_v21 = vld [vmem:[%s2902_s1 + $0xe8] sm:$0xff] (!%p241_p2)  }
   0xc   : > { %v2271_v14 = vld [vmem:[%s2902_s1 + $0x18] sm:$0xff] (!%p241_p2)   ;;  %v2275_v18 = vld [vmem:[%s2902_s1 + $0x20] sm:$0xff] (!%p241_p2)   ;;  %v2279_v22 = vld [vmem:[%s2902_s1 + $0x28] sm:$0xff] (!%p241_p2)  }
   0xd   : > { %1920 = vmatpush3.bf16.msra.mxu0 (!%p241_p2), %v2263_v6  ;;  %v2272_v15 = vld [vmem:[%s2902_s1 + $0x98] sm:$0xff] (!%p241_p2)   ;;  %v2276_v19 = vld [vmem:[%s2902_s1 + $0xa0] sm:$0xff] (!%p241_p2)   ;;  %v2280_v23 = vld [vmem:[%s2902_s1 + $0xa8] sm:$0xff] (!%p241_p2)  }
   0xe   : > { %1984 = vmatpush3.bf16.msra.mxu1 %v2264_v7  ;;  %1921 = vmatprep.subr.bf16.mxu0 %v2265_v8  ;;  %s2910_s12 = smov (!%p274_p3, %s1820_s12), 31  ;;  %v2281_v24 = vld [vmem:[%s2902_s1 + $0x70] sm:$0xff]   ;;  %v2285_v28 = vld [vmem:[%s2902_s1 + $0x78] sm:$0xff]   ;;  %v2289_v44 = vld [vmem:[%s2902_s1 + $0x140] sm:$0xff]  }
   0xf   : > { %1985 = vmatprep.subr.bf16.mxu1 %v2266_v9  ;;  %v2282_v25 = vld [vmem:[%s2902_s1 + $0xf0] sm:$0xff]   ;;  %s2248_s13 = smul.u32 56, %s2910_s12  ;;  %v2286_v29 = vld [vmem:[%s2902_s1 + $0xf8] sm:$0xff]   ;;  %v2290_v45 = vld [vmem:[%s2902_s1 + $0x100] sm:$0xff]  }
  0x10   : > { %v2283_v26 = vld [vmem:[%s2902_s1 + $0x30] sm:$0xff]   ;;  %v2287_v30 = vld [vmem:[%s2902_s1 + $0x38] sm:$0xff]   ;;  %v2291_v57 = vld [vmem:[%s2902_s1 + $0x148] sm:$0xff]  }
  0x11   : > { %1922 = vmatpush3.bf16.msra.mxu0 %v2267_v10  ;;  %v2284_v27 = vld [vmem:[%s2902_s1 + $0xb0] sm:$0xff]   ;;  %s2543_s23 = scalar_lea.vmem %s2901_s0, %s2248_s13  ;;  %v2288_v31 = vld [vmem:[%s2902_s1 + $0xb8] sm:$0xff]   ;;  %v2292_v59 = vld [vmem:[%s2902_s1 + $0x108] sm:$0xff]   ;;  %s1823_s13 = sshll.u32 %s2910_s12, 3 }
  0x12   : > { %1986 = vmatpush3.bf16.msra.mxu1 %v2268_v11  ;;  %1923 = vmatprep.subr.bf16.mxu0 %v2269_v12  ;;  %v288_v32 = vld [vmem:[%s2543_s23 + $0x8] sm:$0xff]  ;;  %v295_v33 = vld [vmem:[%s2543_s23 + $0x40] sm:$0xff]  ;;  %v290_v34 = vld [vmem:[%s2543_s23 + $0x18] sm:$0xff]  ;;  %s2856_s16 = scalar_lea.vmem %s2908_s7, %s1823_s13 }
  0x13   : > { %1987 = vmatprep.subr.bf16.mxu1 %v2270_v13  ;;  %v400_v35 = vpack.c.bf16 %v295_v33, %v288_v32  ;;  %v297_v36 = vld [vmem:[%s2543_s23 + $0x50] sm:$0xff]  ;;  %v287_v37 = vld [vmem:[%s2543_s23] sm:$0xff]  ;;  %v294_v38 = vld [vmem:[%s2543_s23 + $0x38] sm:$0xff] }
  0x14   : > { %v402_v39 = vpack.c.bf16 %v297_v36, %v290_v34  ;;  %v399_v40 = vpack.c.bf16 %v294_v38, %v287_v37  ;;  %v289_v41 = vld [vmem:[%s2543_s23 + $0x10] sm:$0xff]  ;;  %v296_v42 = vld [vmem:[%s2543_s23 + $0x48] sm:$0xff]  ;;  %v302_v46 = vld [vmem:[%s2543_s23 + $0x78] sm:$0xff] }
  0x15   : > { %1924 = vmatpush3.bf16.msra.mxu0 %v2271_v14  ;;  %911 = vmatprep.mubr.bf16.mxu0 %v400_v35  ;;  %v401_v43 = vpack.c.bf16 %v296_v42, %v289_v41  ;;  %v309_v47 = vld [vmem:[%s2543_s23 + $0xb0] sm:$0xff]  ;;  %v304_v48 = vld [vmem:[%s2543_s23 + $0x88] sm:$0xff]  ;;  %v311_v49 = vld [vmem:[%s2543_s23 + $0xc0] sm:$0xff] }
  0x16   : > { %1988 = vmatpush3.bf16.msra.mxu1 %v2272_v15  ;;  %1925 = vmatprep.subr.bf16.mxu0 %v2273_v16  ;;  %v407_v50 = vpack.c.bf16 %v309_v47, %v302_v46  ;;  %v409_v51 = vpack.c.bf16 %v311_v49, %v304_v48  ;;  %v301_v52 = vld [vmem:[%s2543_s23 + $0x70] sm:$0xff]  ;;  %v308_v53 = vld [vmem:[%s2543_s23 + $0xa8] sm:$0xff]  ;;  %v303_v54 = vld [vmem:[%s2543_s23 + $0x80] sm:$0xff] }
  0x17   : > { %1989 = vmatprep.subr.bf16.mxu1 %v2274_v17  ;;  %1008 = vmatprep.mubr.bf16.mxu1 %v402_v39  ;;  %v310_v55 = vld [vmem:[%s2543_s23 + $0xb8] sm:$0xff]  ;;  %v406_v56 = vpack.c.bf16 %v308_v53, %v301_v52  ;;  %v316_v60 = vld [vmem:[%s2543_s23 + $0xe8] sm:$0xff]  ;;  %v323_v61 = vld [vmem:[%s2543_s23 + $0x120] sm:$0xff] }
  0x18   : > { %v408_v58 = vpack.c.bf16 %v310_v55, %v303_v54  ;;  %v414_v62 = vpack.c.bf16 %v323_v61, %v316_v60  ;;  %v318_v63 = vld [vmem:[%s2543_s23 + $0xf8] sm:$0xff]  ;;  %v325_v0 = vld [vmem:[%s2543_s23 + $0x130] sm:$0xff]  ;;  %v315_v2 = vld [vmem:[%s2543_s23 + $0xe0] sm:$0xff] }
  0x19   : > { %1926 = vmatpush3.bf16.msra.mxu0 %v2275_v18  ;;  %v416_v1 = vpack.c.bf16 %v325_v0, %v318_v63  ;;  %v322_v3 = vld [vmem:[%s2543_s23 + $0x118] sm:$0xff]  ;;  %v317_v4 = vld [vmem:[%s2543_s23 + $0xf0] sm:$0xff]  ;;  %v324_v7 = vld [vmem:[%s2543_s23 + $0x128] sm:$0xff] }
  0x1a   : > { %1990 = vmatpush3.bf16.msra.mxu1 %v2276_v19  ;;  %1927 = vmatprep.subr.bf16.mxu0 %v2277_v20  ;;  %v2293_v5 = vld [vmem:[%s2902_s1 + $0x150] sm:$0xff]   ;;  %v330_v8 = vld [vmem:[%s2543_s23 + $0x158] sm:$0xff]  ;;  %v332_v10 = vld [vmem:[%s2543_s23 + $0x168] sm:$0xff]  ;;  %v413_v12 = vpack.c.bf16 %v322_v3, %v315_v2  ;;  %v415_v13 = vpack.c.bf16 %v324_v7, %v317_v4 }
  0x1b   : > { %1991 = vmatprep.subr.bf16.mxu1 %v2278_v21  ;;  %v2294_v6 = vld [vmem:[%s2902_s1 + $0x110] sm:$0xff]   ;;  %v339_v11 = vld [vmem:[%s2543_s23 + $0x1a0] sm:$0xff]  ;;  %v2295_v15 = vld [vmem:[%s2902_s1 + $0x158] sm:$0xff]  }
  0x1c   : > { %v337_v9 = vld [vmem:[%s2543_s23 + $0x190] sm:$0xff]  ;;  %v423_v16 = vpack.c.bf16 %v339_v11, %v332_v10  ;;  %v2296_v17 = vld [vmem:[%s2902_s1 + $0x118] sm:$0xff]   ;;  %v336_v19 = vld [vmem:[%s2543_s23 + $0x188] sm:$0xff] }
  0x1d   : > { %1928 = vmatpush3.bf16.msra.mxu0 %v2279_v22  ;;  %v421_v14 = vpack.c.bf16 %v337_v9, %v330_v8  ;;  %v329_v18 = vld [vmem:[%s2543_s23 + $0x150] sm:$0xff]  ;;  %v331_v20 = vld [vmem:[%s2543_s23 + $0x160] sm:$0xff]  ;;  %v338_v21 = vld [vmem:[%s2543_s23 + $0x198] sm:$0xff] }
  0x1e   : > { %1992 = vmatpush3.bf16.msra.mxu1 %v2280_v23  ;;  %1929 = vmatprep.subr.bf16.mxu0 %v2281_v24  ;;  %v344_v22 = vld [vmem:[%s2543_s23 + $0x1c8] sm:$0xff]  ;;  %v351_v23 = vld [vmem:[%s2543_s23 + $0x200] sm:$0xff]  ;;  %v350_v35 = vld [vmem:[%s2543_s23 + $0x1f8] sm:$0xff] }
  0x1f   : > { %1993 = vmatprep.subr.bf16.mxu1 %v2282_v25  ;;  %v2297_v24 = vld [vmem:[%s2902_s1 + $0x160] sm:$0xff]   ;;  %v346_v25 = vld [vmem:[%s2543_s23 + $0x1d8] sm:$0xff]  ;;  %v2299_v32 = vld [vmem:[%s2902_s1 + $0x168] sm:$0xff]  }
  0x20   : > { %v2300_v33 = vld [vmem:[%s2902_s1 + $0x128] sm:$0xff]   ;;  %v343_v34 = vld [vmem:[%s2543_s23 + $0x1c0] sm:$0xff]  ;;  %v345_v36 = vld [vmem:[%s2543_s23 + $0x1d0] sm:$0xff] }
  0x21   : > { %1930 = vmatpush3.bf16.msra.mxu0 %v2283_v26  ;;  %v353_v26 = vld [vmem:[%s2543_s23 + $0x210] sm:$0xff]  ;;  %v352_v37 = vld [vmem:[%s2543_s23 + $0x208] sm:$0xff]  ;;  %v358_v38 = vld [vmem:[%s2543_s23 + $0x238] sm:$0xff] }
  0x22   : > { %1994 = vmatpush3.bf16.msra.mxu1 %v2284_v27  ;;  %1931 = vmatprep.subr.bf16.mxu0 %v2285_v28  ;;  %v2298_v27 = vld [vmem:[%s2902_s1 + $0x120] sm:$0xff]   ;;  %v420_v28 = vpack.c.bf16 %v336_v19, %v329_v18  ;;  %v365_v39 = vld [vmem:[%s2543_s23 + $0x270] sm:$0xff]  ;;  %v2303_v49 = vld [vmem:[%s2902_s1 + $0x178] sm:$0xff]  }
  0x23   : > { %1995 = vmatprep.subr.bf16.mxu1 %v2286_v29  ;;  %v422_v29 = vpack.c.bf16 %v338_v21, %v331_v20  ;;  %v367_v41 = vld [vmem:[%s2543_s23 + $0x280] sm:$0xff]  ;;  %v2301_v42 = vld [vmem:[%s2902_s1 + $0x170] sm:$0xff]   ;;  %v435_v46 = vpack.c.bf16 %v365_v39, %v358_v38  ;;  %v2304_v52 = vld [vmem:[%s2902_s1 + $0x138] sm:$0xff]  }
  0x24   : > { %v357_v48 = vld [vmem:[%s2543_s23 + $0x230] sm:$0xff]  ;;  %v366_v53 = vld [vmem:[%s2543_s23 + $0x278] sm:$0xff]  ;;  %v372_v54 = vld [vmem:[%s2543_s23 + $0x2a8] sm:$0xff] }
  0x25   : > { %1932 = vmatpush3.bf16.msra.mxu0 %v2287_v30  ;;  %v428_v30 = vpack.c.bf16 %v351_v23, %v344_v22  ;;  %v379_v55 = vld [vmem:[%s2543_s23 + $0x2e0] sm:$0xff]  ;;  %v378_v0 = vld [vmem:[%s2543_s23 + $0x2d8] sm:$0xff]  ;;  %v380_v2 = vld [vmem:[%s2543_s23 + $0x2e8] sm:$0xff] }
  0x26   : > { %1996 = vmatpush3.bf16.msra.mxu1 %v2288_v31  ;;  %2045 = vmatprep.subr.bf16.mxu0 %v2289_v44  ;;  %v430_v31 = vpack.c.bf16 %v353_v26, %v346_v25  ;;  %v442_v60 = vpack.c.bf16 %v379_v55, %v372_v54  ;;  %v371_v63 = vld [vmem:[%s2543_s23 + $0x2a0] sm:$0xff]  ;;  %v386_v3 = vld [vmem:[%s2543_s23 + $0x318] sm:$0xff]  ;;  %v393_v4 = vld [vmem:[%s2543_s23 + $0x350] sm:$0xff] }
  0x27   : > { %2232 = vmatprep.subr.bf16.mxu1 %v2289_v44  ;;  %v2302_v44 = vld [vmem:[%s2902_s1 + $0x130] sm:$0xff]   ;;  %v441_v7 = vpack.c.bf16 %v378_v0, %v371_v63  ;;  %v449_v9 = vpack.c.bf16 %v393_v4, %v386_v3  ;;  %v383_v18 = vld [vmem:[%s2543_s23 + $0x300] sm:$0xff]  ;;  %v382_v26 = vld [vmem:[%s2543_s23 + $0x2f8] sm:$0xff] }
  0x28   : > { %912 = vmatmul.mubr.bf16.vlgmr.msra.gmra.mrb[0].mxu0 %v399_v40  ;;  %v360_v40 = vld [vmem:[%s2543_s23 + $0x248] sm:$0xff]  ;;  %v385_v11 = vld [vmem:[%s2543_s23 + $0x310] sm:$0xff]  ;;  %v291_v23 = vld [vmem:[%s2543_s23 + $0x20] sm:$0xff] }
  0x29   : > { %1009 = vmatmul.mubr.bf16.vlgmr.msra.gmra.mrb[0].mxu1 %v401_v43  ;;  %2046 = vmatpush3.bf16.msra.mxu0 %v2290_v45  ;;  %v427_v43 = vpack.c.bf16 %v350_v35, %v343_v34  ;;  %v437_v47 = vpack.c.bf16 %v367_v41, %v360_v40  ;;  %v375_v25 = vld [vmem:[%s2543_s23 + $0x2c0] sm:$0xff]  ;;  %v305_v35 = vld [vmem:[%s2543_s23 + $0x90] sm:$0xff]  ;;  %v396_v38 = vld [vmem:[%s2543_s23 + $0x368] sm:$0xff] }
  0x2a   : > { %2240 = vmatpush3.bf16.msra.mxu1 %v2290_v45  ;;  %919 = vmatprep.mubr.bf16.mxu0 %v407_v50  ;;  %v429_v45 = vpack.c.bf16 %v352_v37, %v345_v36  ;;  %v364_v50 = vld [vmem:[%s2543_s23 + $0x268] sm:$0xff]  ;;  %v389_v37 = vld [vmem:[%s2543_s23 + $0x330] sm:$0xff]  ;;  %v327_v40 = vld [vmem:[%s2543_s23 + $0x140] sm:$0xff] }
  0x2b   : > { %1016 = vmatprep.mubr.bf16.mxu1 %v409_v51  ;;  %2047 = vmatprep.subr.bf16.mxu0 %v2291_v57  ;;  %v359_v51 = vld [vmem:[%s2543_s23 + $0x240] sm:$0xff]  ;;  %v312_v36 = vld [vmem:[%s2543_s23 + $0xc8] sm:$0xff]  ;;  %v293_v41 = vld [vmem:[%s2543_s23 + $0x30] sm:$0xff] }
  0x2c   : > { %2233 = vmatprep.subr.bf16.mxu1 %v2291_v57  ;;  %v381_v57 = vld [vmem:[%s2543_s23 + $0x2f0] sm:$0xff]  ;;  %v320_v39 = vld [vmem:[%s2543_s23 + $0x108] sm:$0xff]  ;;  %v355_v0 = vld [vmem:[%s2543_s23 + $0x220] sm:$0xff] }
  0x2d   : > { %2048 = vmatpush3.bf16.msra.mxu0 %v2292_v59  ;;  %v328_v54 = vld [vmem:[%s2543_s23 + $0x148] sm:$0xff] }
  0x2e   : > { %2241 = vmatpush3.bf16.msra.mxu1 %v2292_v59  ;;  %2049 = vmatprep.subr.bf16.mxu0 %v2293_v5  ;;  %v436_v59 = vpack.c.bf16 %v366_v53, %v359_v51  ;;  %v334_v51 = vld [vmem:[%s2543_s23 + $0x178] sm:$0xff]  ;;  %v321_v53 = vld [vmem:[%s2543_s23 + $0x110] sm:$0xff]  ;;  %v348_v63 = vld [vmem:[%s2543_s23 + $0x1e8] sm:$0xff] }
  0x2f   : > { %2234 = vmatprep.subr.bf16.mxu1 %v2293_v5  ;;  %v388_v5 = vld [vmem:[%s2543_s23 + $0x328] sm:$0xff] }
  0x30   : > { %920 = vmatmul.mubr.bf16.gmra.mrb[4].mxu0 %v406_v56  ;;  %v374_v56 = vld [vmem:[%s2543_s23 + $0x2b8] sm:$0xff] }
  0x31   : > { %1017 = vmatmul.mubr.bf16.gmra.mrb[4].mxu1 %v408_v58  ;;  %927 = vmatprep.mubr.bf16.mxu0 %v414_v62  ;;  %v434_v58 = vpack.c.bf16 %v364_v50, %v357_v48  ;;  %v444_v61 = vpack.c.bf16 %v381_v57, %v374_v56  ;;  %v2305_v62 = vld [vmem:[%s2902_s1 + $0x180] sm:$0xff]   ;;  %v326_v48 = vld [vmem:[%s2543_s23 + $0x138] sm:$0xff] }
  0x32   : > { %1024 = vmatprep.mubr.bf16.mxu1 %v416_v1  ;;  %2050 = vmatpush3.bf16.msra.mxu0 %v2294_v6  ;;  %v373_v1 = vld [vmem:[%s2543_s23 + $0x2b0] sm:$0xff]  ;;  %v314_v50 = vld [vmem:[%s2543_s23 + $0xd8] sm:$0xff] }
  0x33   : > { %2242 = vmatpush3.bf16.msra.mxu1 %v2294_v6  ;;  %2051 = vmatprep.subr.bf16.mxu0 %v2295_v15  ;;  %v395_v6 = vld [vmem:[%s2543_s23 + $0x360] sm:$0xff]  ;;  %v443_v8 = vpack.c.bf16 %v380_v2, %v373_v1  ;;  %v349_v1 = vld [vmem:[%s2543_s23 + $0x1f0] sm:$0xff]  ;;  %v356_v2 = vld [vmem:[%s2543_s23 + $0x228] sm:$0xff] }
  0x34   : > { %2235 = vmatprep.subr.bf16.mxu1 %v2295_v15  ;;  %v451_v10 = vpack.c.bf16 %v395_v6, %v388_v5  ;;  %v292_v15 = vld [vmem:[%s2543_s23 + $0x28] sm:$0xff]  ;;  %v432_v5 = vpack.c.bf16 %v355_v0, %v348_v63  ;;  %v433_v6 = vpack.c.bf16 %v356_v2, %v349_v1  ;;  %v2318_v63 = vld [vmem:[%s2906_s5 + $0x20] sm:$0xff]  }
  0x36   : > { %2052 = vmatpush3.bf16.msra.mxu0 %v2296_v17 }
  0x37   : > { %2243 = vmatpush3.bf16.msra.mxu1 %v2296_v17  ;;  %2053 = vmatprep.subr.bf16.mxu0 %v2297_v24  ;;  %v376_v17 = vld [vmem:[%s2543_s23 + $0x2c8] sm:$0xff] }
  0x38   : > { %928 = vmatmul.mubr.bf16.gmra.mrb[8].mxu0 %v413_v12  ;;  %2236 = vmatprep.subr.bf16.mxu1 %v2297_v24  ;;  %v392_v12 = vld [vmem:[%s2543_s23 + $0x348] sm:$0xff]  ;;  %v446_v22 = vpack.c.bf16 %v383_v18, %v376_v17  ;;  %v298_v24 = vld [vmem:[%s2543_s23 + $0x58] sm:$0xff] }
  0x39   : > { %1025 = vmatmul.mubr.bf16.gmra.mrb[8].mxu1 %v415_v13  ;;  %935 = vmatprep.mubr.bf16.mxu0 %v421_v14  ;;  %v387_v13 = vld [vmem:[%s2543_s23 + $0x320] sm:$0xff]  ;;  %v394_v14 = vld [vmem:[%s2543_s23 + $0x358] sm:$0xff]  ;;  %v448_v19 = vpack.c.bf16 %v392_v12, %v385_v11  ;;  %v369_v12 = vld [vmem:[%s2543_s23 + $0x290] sm:$0xff] }
  0x3a   : > { %1032 = vmatprep.mubr.bf16.mxu1 %v423_v16  ;;  %2054 = vmatpush3.bf16.msra.mxu0 %v2298_v27  ;;  %v299_v16 = vld [vmem:[%s2543_s23 + $0x60] sm:$0xff]  ;;  %v450_v20 = vpack.c.bf16 %v394_v14, %v387_v13  ;;  %v362_v11 = vld [vmem:[%s2543_s23 + $0x258] sm:$0xff]  ;;  %v377_v13 = vld [vmem:[%s2543_s23 + $0x2d0] sm:$0xff] }
  0x3b   : > { %2244 = vmatpush3.bf16.msra.mxu1 %v2298_v27  ;;  %2055 = vmatprep.subr.bf16.mxu0 %v2299_v32  ;;  %v404_v21 = vpack.c.bf16 %v299_v16, %v292_v15  ;;  %v306_v27 = vld [vmem:[%s2543_s23 + $0x98] sm:$0xff]  ;;  %v384_v14 = vld [vmem:[%s2543_s23 + $0x308] sm:$0xff]  ;;  %v439_v17 = vpack.c.bf16 %v369_v12, %v362_v11 }
  0x3c   : > { %2237 = vmatprep.subr.bf16.mxu1 %v2299_v32  ;;  %v445_v32 = vpack.c.bf16 %v382_v26, %v375_v25  ;;  %v447_v18 = vpack.c.bf16 %v384_v14, %v377_v13  ;;  %v2306_v25 = vld [vmem:[%s2904_s3] sm:$0xff]   ;;  %v2307_v26 = vld [vmem:[%s2904_s3 + $0x8] sm:$0xff]  }
  0x3e   : > { %2056 = vmatpush3.bf16.msra.mxu0 %v2300_v33 }
  0x3f   : > { %2245 = vmatpush3.bf16.msra.mxu1 %v2300_v33  ;;  %2057 = vmatprep.subr.bf16.mxu0 %v2301_v42 }
  0x40   : > { %936 = vmatmul.mubr.bf16.gmra.mrb[12].mxu0 %v420_v28  ;;  %2238 = vmatprep.subr.bf16.mxu1 %v2301_v42  ;;  %v313_v28 = vld [vmem:[%s2543_s23 + $0xd0] sm:$0xff]  ;;  %v300_v42 = vld [vmem:[%s2543_s23 + $0x68] sm:$0xff] }
  0x41   : > { %1033 = vmatmul.mubr.bf16.gmra.mrb[12].mxu1 %v422_v29  ;;  %943 = vmatprep.mubr.bf16.mxu0 %v428_v30  ;;  %v390_v29 = vld [vmem:[%s2543_s23 + $0x338] sm:$0xff]  ;;  %v397_v30 = vld [vmem:[%s2543_s23 + $0x370] sm:$0xff]  ;;  %v411_v33 = vpack.c.bf16 %v313_v28, %v306_v27 }
  0x42   : > { %1040 = vmatprep.mubr.bf16.mxu1 %v430_v31  ;;  %2058 = vmatpush3.bf16.msra.mxu0 %v2302_v44  ;;  %v403_v31 = vpack.c.bf16 %v298_v24, %v291_v23  ;;  %v453_v34 = vpack.c.bf16 %v397_v30, %v390_v29  ;;  %v2308_v27 = vld [vmem:[%s2904_s3 + $0x10] sm:$0xff]   ;;  %v2309_v28 = vld [vmem:[%s2904_s3 + $0x18] sm:$0xff]   ;;  %v2310_v29 = vld [vmem:[%s2904_s3 + $0x20] sm:$0xff]  }
  0x43   : > { %2246 = vmatpush3.bf16.msra.mxu1 %v2302_v44  ;;  %2059 = vmatprep.subr.bf16.mxu0 %v2303_v49  ;;  %v452_v44 = vpack.c.bf16 %v396_v38, %v389_v37  ;;  %v2311_v30 = vld [vmem:[%s2904_s3 + $0x28] sm:$0xff]  }
  0x44   : > { %2239 = vmatprep.subr.bf16.mxu1 %v2303_v49  ;;  %v307_v49 = vld [vmem:[%s2543_s23 + $0xa0] sm:$0xff] }
  0x45   : > { %v412_v56 = vpack.c.bf16 %v314_v50, %v307_v49 }
  0x46   : > { %2060 = vmatpush3.bf16.msra.mxu0 %v2304_v52 }
  0x47   : > { %2247 = vmatpush3.bf16.msra.mxu1 %v2304_v52  ;;  %v341_v52 = vld [vmem:[%s2543_s23 + $0x1b0] sm:$0xff] }
  0x48   : > { %944 = vmatmul.mubr.bf16.gmra.mrb[16].mxu0 %v427_v43  ;;  %2150 = vmatprep.subr.bf16.mxu1 %v2305_v62  ;;  %v410_v43 = vpack.c.bf16 %v312_v36, %v305_v35  ;;  %v425_v57 = vpack.c.bf16 %v341_v52, %v334_v51  ;;  %v2755_v36 = vld [vmem:[%s2903_s2] ss:$0 sm:$0xff]  ;;  %v2317_v52 = vld [vmem:[%s2906_s5 + $0x18] sm:$0xff]  }
  0x49   : > { %1041 = vmatmul.mubr.bf16.gmra.mrb[16].mxu1 %v429_v45  ;;  %951 = vmatprep.mubr.bf16.mxu0 %v435_v46  ;;  %v418_v45 = vpack.c.bf16 %v327_v40, %v320_v39  ;;  %v405_v46 = vpack.c.bf16 %v300_v42, %v293_v41 }
  0x4a   : > { %1048 = vmatprep.mubr.bf16.mxu1 %v437_v47  ;;  %v319_v47 = vld [vmem:[%s2543_s23 + $0x100] sm:$0xff] }
  0x4b   : > { %v417_v55 = vpack.c.bf16 %v326_v48, %v319_v47 }
  0x50   : > { %952 = vmatmul.mubr.bf16.gmra.mrb[20].mxu0 %v434_v58  ;;  %v419_v58 = vpack.c.bf16 %v328_v54, %v321_v53 }
  0x51   : > { %1049 = vmatmul.mubr.bf16.gmra.mrb[20].mxu1 %v436_v59  ;;  %959 = vmatprep.mubr.bf16.mxu0 %v442_v60  ;;  %v333_v59 = vld [vmem:[%s2543_s23 + $0x170] sm:$0xff]  ;;  %v340_v60 = vld [vmem:[%s2543_s23 + $0x1a8] sm:$0xff] }
  0x52   : > { %1056 = vmatprep.mubr.bf16.mxu1 %v444_v61  ;;  %v335_v61 = vld [vmem:[%s2543_s23 + $0x180] sm:$0xff]  ;;  %v424_v3 = vpack.c.bf16 %v340_v60, %v333_v59 }
  0x58   : > { %960 = vmatmul.mubr.bf16.gmra.mrb[24].mxu0 %v441_v7  ;;  %v347_v7 = vld [vmem:[%s2543_s23 + $0x1e0] sm:$0xff] }
  0x59   : > { %1057 = vmatmul.mubr.bf16.gmra.mrb[24].mxu1 %v443_v8  ;;  %967 = vmatprep.mubr.bf16.mxu0 %v449_v9  ;;  %v354_v8 = vld [vmem:[%s2543_s23 + $0x218] sm:$0xff]  ;;  %v363_v9 = vld [vmem:[%s2543_s23 + $0x260] sm:$0xff] }
  0x5a   : > { %1064 = vmatprep.mubr.bf16.mxu1 %v451_v10  ;;  %v370_v10 = vld [vmem:[%s2543_s23 + $0x298] sm:$0xff]  ;;  %v431_v15 = vpack.c.bf16 %v354_v8, %v347_v7 }
  0x5b   : > { %v440_v16 = vpack.c.bf16 %v370_v10, %v363_v9 }
  0x60   : > { %968 = vmatmul.mubr.bf16.gmra.mrb[28].mxu0 %v448_v19  ;;  %v361_v19 = vld [vmem:[%s2543_s23 + $0x250] sm:$0xff] }
  0x61   : > { %1065 = vmatmul.mubr.bf16.gmra.mrb[28].mxu1 %v450_v20  ;;  %1105 = vmatprep.mubr.bf16.mxu0 %v404_v21  ;;  %v368_v20 = vld [vmem:[%s2543_s23 + $0x288] sm:$0xff]  ;;  %v391_v21 = vld [vmem:[%s2543_s23 + $0x340] sm:$0xff] }
  0x62   : > { %1153 = vmatprep.mubr.bf16.mxu1 %v446_v22  ;;  %v398_v22 = vld [vmem:[%s2543_s23 + $0x378] sm:$0xff]  ;;  %v438_v23 = vpack.c.bf16 %v368_v20, %v361_v19 }
  0x63   : > { %v454_v24 = vpack.c.bf16 %v398_v22, %v391_v21 }
  0x68   : > { %1106 = vmatmul.mubr.bf16.vlgmr.msra.gmra.mrb[32].mxu0 %v403_v31  ;;  %v2312_v31 = vld [vmem:[%s2904_s3 + $0x30] sm:$0xff]  }
  0x69   : > { %1154 = vmatmul.mubr.bf16.vlgmr.msra.gmra.mrb[32].mxu1 %v445_v32  ;;  %1113 = vmatprep.mubr.bf16.mxu0 %v411_v33  ;;  %v2313_v32 = vld [vmem:[%s2904_s3 + $0x38] sm:$0xff]   ;;  %v2314_v33 = vld [vmem:[%s2906_s5] sm:$0xff]  }
  0x6a   : > { %1161 = vmatprep.mubr.bf16.mxu1 %v453_v34  ;;  %2151 = vmatpush3.bf16.msra.mxu1 %v2305_v62  ;;  %v342_v62 = vld [vmem:[%s2543_s23 + $0x1b8] sm:$0xff]  ;;  %v2315_v34 = vld [vmem:[%s2906_s5 + $0x8] sm:$0xff]  }
  0x6b   : > { %v426_v4 = vpack.c.bf16 %v342_v62, %v335_v61  ;;  %2168 = vmatprep.subr.bf16.mxu1 %v2306_v25  ;;  %2200 = vmatprep.subr.bf16.mxu0 %v2314_v33 }
  0x6c   : > { %2201 = vmatpush3.bf16.msra.mxu0 %v2314_v33 }
  0x6d   : > { %2202 = vmatprep.subr.bf16.mxu0 %v2315_v34 }
  0x70   : > { %1114 = vmatmul.mubr.bf16.gmra.mrb[36].mxu0 %v410_v43 }
  0x71   : > { %1162 = vmatmul.mubr.bf16.gmra.mrb[36].mxu1 %v452_v44  ;;  %1121 = vmatprep.mubr.bf16.mxu0 %v418_v45  ;;  %v2316_v45 = vld [vmem:[%s2906_s5 + $0x10] sm:$0xff]  }
  0x72   : > { %2152 = vmatprep.mubr.msk.bf16.mxu1 %vm854_vm0, %v405_v46  ;;  %2203 = vmatpush3.bf16.msra.mxu0 %v2315_v34 }
  0x73   : > { %2204 = vmatprep.subr.bf16.mxu0 %v2316_v45 }
  0x76   : > { %2205 = vmatpush3.bf16.msra.mxu0 %v2316_v45 }
  0x77   : > { %2206 = vmatprep.subr.bf16.mxu0 %v2317_v52 }
  0x78   : > { %1122 = vmatmul.mubr.bf16.gmra.mrb[40].mxu0 %v417_v55 }
  0x79   : > { %2153 = vmatmul.mubr.msk.bf16.vlgmr.msra.gmra.mrb[40].mxu1 %vm854_vm0, %v412_v56  ;;  %1129 = vmatprep.mubr.bf16.mxu0 %v425_v57 }
  0x7a   : > { %2156 = vmatprep.mubr.msk.bf16.mxu1 %vm854_vm0, %v419_v58  ;;  %2169 = vmatpush3.bf16.msra.mxu1 %v2306_v25 }
  0x7b   : > { %2170 = vmatprep.subr.bf16.mxu1 %v2307_v26  ;;  %2207 = vmatpush3.bf16.msra.mxu0 %v2317_v52 }
  0x7c   : > { %2208 = vmatprep.subr.bf16.mxu0 %v2318_v63 }
  0x7e   : > { %2171 = vmatpush3.bf16.msra.mxu1 %v2307_v26 }
  0x7f   : > { %2172 = vmatprep.subr.bf16.mxu1 %v2308_v27  ;;  %2209 = vmatpush3.bf16.msra.mxu0 %v2318_v63 }
  0x80   : > { %1130 = vmatmul.mubr.bf16.gmra.mrb[44].mxu0 %v424_v3 }
  0x81   : > { %2157 = vmatmul.mubr.msk.bf16.gmra.mrb[44].mxu1 %vm854_vm0, %v426_v4  ;;  %1137 = vmatprep.mubr.bf16.mxu0 %v432_v5 }
  0x82   : > { %2160 = vmatprep.mubr.msk.bf16.mxu1 %vm854_vm0, %v433_v6  ;;  %2173 = vmatpush3.bf16.msra.mxu1 %v2308_v27  ;;  %v2319_v6 = vld [vmem:[%s2906_s5 + $0x28] sm:$0xff]  }
  0x83   : > { %2174 = vmatprep.subr.bf16.mxu1 %v2309_v28  ;;  %2210 = vmatprep.subr.bf16.mxu0 %v2319_v6 }
  0x84   : > { %2211 = vmatpush3.bf16.msra.mxu0 %v2319_v6 }
  0x86   : > { %2175 = vmatpush3.bf16.msra.mxu1 %v2309_v28 }
  0x87   : > { %2176 = vmatprep.subr.bf16.mxu1 %v2310_v29 }
  0x88   : > { %1138 = vmatmul.mubr.bf16.gmra.mrb[48].mxu0 %v431_v15 }
  0x89   : > { %2161 = vmatmul.mubr.msk.bf16.gmra.mrb[48].mxu1 %vm854_vm0, %v440_v16  ;;  %1145 = vmatprep.mubr.bf16.mxu0 %v439_v17 }
  0x8a   : > { %2164 = vmatprep.mubr.msk.bf16.mxu1 %vm854_vm0, %v447_v18  ;;  %2177 = vmatpush3.bf16.msra.mxu1 %v2310_v29 }
  0x8b   : > { %2178 = vmatprep.subr.bf16.mxu1 %v2311_v30 }
  0x8e   : > { %2179 = vmatpush3.bf16.msra.mxu1 %v2311_v30 }
  0x8f   : > { %2180 = vmatprep.subr.bf16.mxu1 %v2312_v31 }
  0x90   : > { %1146 = vmatmul.mubr.bf16.gmra.mrb[52].mxu0 %v438_v23 }
  0x91   : > { %2165 = vmatmul.mubr.msk.bf16.gmra.mrb[52].mxu1 %vm854_vm0, %v454_v24 }
  0x92   : > { %2181 = vmatpush3.bf16.msra.mxu1 %v2312_v31 }
  0x93   : > { %2182 = vmatprep.subr.bf16.mxu1 %v2313_v32 }
  0x96   : > { %2183 = vmatpush3.bf16.msra.mxu1 %v2313_v32 }
  0xfb   : > { %v1933_v35 = vpop.f32.mrb[0].mxu0 }
  0xfc   : > { %v1934_v37 = vpop.f32.mrb[1].mxu0  ;;  %v1997_v38 = vpop.f32.mrb[0].mxu1 }
  0xfd   : > { %v1935_v39 = vadd.f32 %v1934_v37, %v1933_v35  ;;  %v1936_v40 = vpop.f32.mrb[2].mxu0  ;;  %v1998_v41 = vpop.f32.mrb[1].mxu1 }
  0xfe   : > { %v1937_v42 = vpop.f32.mrb[3].mxu0  ;;  %v1999_v43 = vadd.f32 %v1998_v41, %v1997_v38  ;;  %v2000_v44 = vpop.f32.mrb[2].mxu1 }
  0xff   : > { %v914_v46 = vadd.f32 %v1935_v39, %v2755_v36  ;;  %v1938_v47 = vadd.f32 %v1937_v42, %v1936_v40  ;;  %v2001_v48 = vpop.f32.mrb[3].mxu1 }
 0x100   : > { %v2002_v49 = vadd.f32 %v2001_v48, %v2000_v44 }
 0x101   : > { %v917_v50 = vadd.f32 %v1938_v47, %v2755_v36  ;;  %v2762_v51 = vadd.f32 %v1999_v43, %v914_v46 }
 0x103   : > { %v2767_v53 = vadd.f32 %v2002_v49, %v917_v50  ;;  %v1939_v54 = vpop.f32.mrb[4].mxu0 }
 0x104   : > { %v1940_v55 = vpop.f32.mrb[5].mxu0  ;;  %v2003_v56 = vpop.f32.mrb[4].mxu1 }
 0x105   : > { %v1941_v57 = vadd.f32 %v1940_v55, %v1939_v54  ;;  %v1942_v58 = vpop.f32.mrb[6].mxu0  ;;  %v2004_v59 = vpop.f32.mrb[5].mxu1 }
 0x106   : > { %v1943_v60 = vpop.f32.mrb[7].mxu0  ;;  %v2005_v61 = vadd.f32 %v2004_v59, %v2003_v56  ;;  %v2006_v62 = vpop.f32.mrb[6].mxu1 }
 0x107   : > { %v922_v0 = vadd.f32 %v1941_v57, %v2755_v36  ;;  %v1944_v1 = vadd.f32 %v1943_v60, %v1942_v58  ;;  %v2007_v2 = vpop.f32.mrb[7].mxu1 }
 0x108   : > { %v2008_v3 = vadd.f32 %v2007_v2, %v2006_v62 }
 0x109   : > { %v925_v4 = vadd.f32 %v1944_v1, %v2755_v36  ;;  %v2774_v5 = vadd.f32 %v2005_v61, %v922_v0 }
 0x10b   : > { %v2779_v7 = vadd.f32 %v2008_v3, %v925_v4  ;;  %v1945_v8 = vpop.f32.mrb[8].mxu0 }
 0x10c   : > { %v1946_v9 = vpop.f32.mrb[9].mxu0  ;;  %v2009_v10 = vpop.f32.mrb[8].mxu1 }
 0x10d   : > { %v1947_v11 = vadd.f32 %v1946_v9, %v1945_v8  ;;  %v1948_v12 = vpop.f32.mrb[10].mxu0  ;;  %v2010_v13 = vpop.f32.mrb[9].mxu1 }
 0x10e   : > { %v1949_v14 = vpop.f32.mrb[11].mxu0  ;;  %v2011_v15 = vadd.f32 %v2010_v13, %v2009_v10  ;;  %v2012_v16 = vpop.f32.mrb[10].mxu1 }
 0x10f   : > { %v930_v17 = vadd.f32 %v1947_v11, %v2755_v36  ;;  %v1950_v18 = vadd.f32 %v1949_v14, %v1948_v12  ;;  %v2013_v19 = vpop.f32.mrb[11].mxu1 }
 0x110   : > { %v2014_v20 = vadd.f32 %v2013_v19, %v2012_v16 }
 0x111   : > { %v933_v21 = vadd.f32 %v1950_v18, %v2755_v36  ;;  %v2783_v22 = vadd.f32 %v2011_v15, %v930_v17 }
 0x113   : > { %v2785_v23 = vadd.f32 %v2014_v20, %v933_v21  ;;  %v1951_v24 = vpop.f32.mrb[12].mxu0 }
 0x114   : > { %v1952_v25 = vpop.f32.mrb[13].mxu0  ;;  %v2015_v26 = vpop.f32.mrb[12].mxu1 }
 0x115   : > { %v1953_v27 = vadd.f32 %v1952_v25, %v1951_v24  ;;  %v1954_v28 = vpop.f32.mrb[14].mxu0  ;;  %v2016_v29 = vpop.f32.mrb[13].mxu1 }
 0x116   : > { %v1955_v30 = vpop.f32.mrb[15].mxu0  ;;  %v2017_v31 = vadd.f32 %v2016_v29, %v2015_v26  ;;  %v2018_v32 = vpop.f32.mrb[14].mxu1 }
 0x117   : > { %v938_v33 = vadd.f32 %v1953_v27, %v2755_v36  ;;  %v1956_v34 = vadd.f32 %v1955_v30, %v1954_v28  ;;  %v2019_v35 = vpop.f32.mrb[15].mxu1 }
 0x118   : > { %v2020_v37 = vadd.f32 %v2019_v35, %v2018_v32 }
 0x119   : > { %v941_v38 = vadd.f32 %v1956_v34, %v2755_v36  ;;  %v2789_v39 = vadd.f32 %v2017_v31, %v938_v33 }
 0x11b   : > { %v2791_v40 = vadd.f32 %v2020_v37, %v941_v38  ;;  %v1957_v41 = vpop.f32.mrb[16].mxu0 }
 0x11c   : > { %v1958_v42 = vpop.f32.mrb[17].mxu0  ;;  %v2021_v43 = vpop.f32.mrb[16].mxu1 }
 0x11d   : > { %v1959_v44 = vadd.f32 %v1958_v42, %v1957_v41  ;;  %v1960_v45 = vpop.f32.mrb[18].mxu0  ;;  %v2022_v46 = vpop.f32.mrb[17].mxu1 }
 0x11e   : > { %v1961_v47 = vpop.f32.mrb[19].mxu0  ;;  %v2023_v48 = vadd.f32 %v2022_v46, %v2021_v43  ;;  %v2024_v49 = vpop.f32.mrb[18].mxu1 }
 0x11f   : > { %v946_v50 = vadd.f32 %v1959_v44, %v2755_v36  ;;  %v1962_v52 = vadd.f32 %v1961_v47, %v1960_v45  ;;  %v2025_v54 = vpop.f32.mrb[19].mxu1 }
 0x120   : > { %v2026_v55 = vadd.f32 %v2025_v54, %v2024_v49 }
 0x121   : > { %v949_v56 = vadd.f32 %v1962_v52, %v2755_v36  ;;  %v2795_v57 = vadd.f32 %v2023_v48, %v946_v50 }
 0x123   : > { %v2797_v58 = vadd.f32 %v2026_v55, %v949_v56  ;;  %v1963_v59 = vpop.f32.mrb[20].mxu0 }
 0x124   : > { %v1964_v60 = vpop.f32.mrb[21].mxu0  ;;  %v2027_v61 = vpop.f32.mrb[20].mxu1 }
 0x125   : > { %v1965_v62 = vadd.f32 %v1964_v60, %v1963_v59  ;;  %v1966_v63 = vpop.f32.mrb[22].mxu0  ;;  %v2028_v0 = vpop.f32.mrb[21].mxu1 }
 0x126   : > { %v1967_v1 = vpop.f32.mrb[23].mxu0  ;;  %v2029_v2 = vadd.f32 %v2028_v0, %v2027_v61  ;;  %v2030_v3 = vpop.f32.mrb[22].mxu1 }
 0x127   : > { %v954_v4 = vadd.f32 %v1965_v62, %v2755_v36  ;;  %v1968_v6 = vadd.f32 %v1967_v1, %v1966_v63  ;;  %v2031_v8 = vpop.f32.mrb[23].mxu1 }
 0x128   : > { %v2032_v9 = vadd.f32 %v2031_v8, %v2030_v3 }
 0x129   : > { %v957_v10 = vadd.f32 %v1968_v6, %v2755_v36  ;;  %v2801_v11 = vadd.f32 %v2029_v2, %v954_v4 }
 0x12b   : > { %v2803_v12 = vadd.f32 %v2032_v9, %v957_v10  ;;  %v1969_v13 = vpop.f32.mrb[24].mxu0 }
 0x12c   : > { %v1970_v14 = vpop.f32.mrb[25].mxu0  ;;  %v2033_v15 = vpop.f32.mrb[24].mxu1 }
 0x12d   : > { %v1971_v16 = vadd.f32 %v1970_v14, %v1969_v13  ;;  %v1972_v17 = vpop.f32.mrb[26].mxu0  ;;  %v2034_v18 = vpop.f32.mrb[25].mxu1 }
 0x12e   : > { %v1973_v19 = vpop.f32.mrb[27].mxu0  ;;  %v2035_v20 = vadd.f32 %v2034_v18, %v2033_v15  ;;  %v2036_v21 = vpop.f32.mrb[26].mxu1 }
 0x12f   : > { %v962_v24 = vadd.f32 %v1971_v16, %v2755_v36  ;;  %v1974_v25 = vadd.f32 %v1973_v19, %v1972_v17  ;;  %v2037_v26 = vpop.f32.mrb[27].mxu1 }
 0x130   : > { %v2038_v27 = vadd.f32 %v2037_v26, %v2036_v21 }
 0x131   : > { %v965_v28 = vadd.f32 %v1974_v25, %v2755_v36  ;;  %v1059_v29 = vadd.f32 %v2035_v20, %v962_v24 }
 0x133   : > { %v1062_v30 = vadd.f32 %v2038_v27, %v965_v28  ;;  %v1975_v31 = vpop.f32.mrb[28].mxu0 }
 0x134   : > { %v1976_v32 = vpop.f32.mrb[29].mxu0  ;;  %v2039_v33 = vpop.f32.mrb[28].mxu1 }
 0x135   : > { %v1977_v34 = vadd.f32 %v1976_v32, %v1975_v31  ;;  %v1978_v35 = vpop.f32.mrb[30].mxu0  ;;  %v2040_v37 = vpop.f32.mrb[29].mxu1 }
 0x136   : > { %v1979_v38 = vpop.f32.mrb[31].mxu0  ;;  %v2041_v41 = vadd.f32 %v2040_v37, %v2039_v33  ;;  %v2042_v42 = vpop.f32.mrb[30].mxu1 }
 0x137   : > { %v970_v43 = vadd.f32 %v1977_v34, %v2755_v36  ;;  %v1980_v44 = vadd.f32 %v1979_v38, %v1978_v35  ;;  %v2043_v45 = vpop.f32.mrb[31].mxu1 }
 0x138   : > { %v2044_v46 = vadd.f32 %v2043_v45, %v2042_v42 }
 0x139   : > { %v973_v47 = vadd.f32 %v1980_v44, %v2755_v36  ;;  %v1067_v48 = vadd.f32 %v2041_v41, %v970_v43 }
 0x13b   : > { %v1070_v49 = vadd.f32 %v2044_v46, %v973_v47  ;;  %v2061_v50 = vpop.f32.mrb[32].mxu0 }
 0x13c   : > { %v2097_v52 = vpop.f32.mrb[32].mxu1  ;;  %v2062_v54 = vpop.f32.mrb[33].mxu0 }
 0x13d   : > { %v2063_v55 = vadd.f32 %v2062_v54, %v2061_v50  ;;  %v2098_v56 = vpop.f32.mrb[33].mxu1  ;;  %v2064_v59 = vpop.f32.mrb[34].mxu0 }
 0x13e   : > { %v2099_v60 = vadd.f32 %v2098_v56, %v2097_v52  ;;  %v2100_v61 = vpop.f32.mrb[34].mxu1  ;;  %v2065_v62 = vpop.f32.mrb[35].mxu0 }
 0x13f   : > { %v2066_v63 = vadd.f32 %v2065_v62, %v2064_v59  ;;  %v2101_v0 = vpop.f32.mrb[35].mxu1  ;;  %v1108_v1 = vadd.f32 %v2063_v55, %v2762_v51 }
 0x140   : > { %v2102_v2 = vadd.f32 %v2101_v0, %v2100_v61  ;;  %v2810_v3 = vadd.f32 %v2099_v60, %v1059_v29 }
 0x141   : > { %v1111_v36 = vadd.f32 %v2066_v63, %v2767_v53 }
 0x142   : > { %v2813_v4 = vadd.f32 %v2102_v2, %v1062_v30 }
 0x143   : > { %v2067_v6 = vpop.f32.mrb[36].mxu0 }
 0x144   : > { %v2103_v8 = vpop.f32.mrb[36].mxu1  ;;  %v2068_v9 = vpop.f32.mrb[37].mxu0 }
 0x145   : > { %v2069_v10 = vadd.f32 %v2068_v9, %v2067_v6  ;;  %v2104_v13 = vpop.f32.mrb[37].mxu1  ;;  %v2070_v14 = vpop.f32.mrb[38].mxu0 }
 0x146   : > { %v2105_v15 = vadd.f32 %v2104_v13, %v2103_v8  ;;  %v2106_v16 = vpop.f32.mrb[38].mxu1  ;;  %v2071_v17 = vpop.f32.mrb[39].mxu0 }
 0x147   : > { %v2072_v18 = vadd.f32 %v2071_v17, %v2070_v14  ;;  %v2107_v19 = vpop.f32.mrb[39].mxu1  ;;  %v1116_v51 = vadd.f32 %v2069_v10, %v2774_v5 }
 0x148   : > { %v2108_v20 = vadd.f32 %v2107_v19, %v2106_v16  ;;  %v2816_v21 = vadd.f32 %v2105_v15, %v1067_v48 }
 0x149   : > { %v1119_v53 = vadd.f32 %v2072_v18, %v2779_v7 }
 0x14a   : > { %v2819_v24 = vadd.f32 %v2108_v20, %v1070_v49 }
 0x14b   : > { %v2073_v25 = vpop.f32.mrb[40].mxu0 }
 0x14c   : > { %v2154_v26 = vpop.f32.mrb[40].mxu1  ;;  %v2074_v27 = vpop.f32.mrb[41].mxu0 }
 0x14d   : > { %v1213_v28 = vadd.f32 %v2154_v26, %v1116_v51  ;;  %v2075_v29 = vadd.f32 %v2074_v27, %v2073_v25  ;;  %v1204_v30 = vpop.f32.mrb[41].mxu1  ;;  %v2076_v31 = vpop.f32.mrb[42].mxu0 }
 0x14e   : > { %v1205_v32 = vadd.f32 %v1204_v30, %v1108_v1  ;;  %v2155_v33 = vpop.f32.mrb[42].mxu1  ;;  %v2077_v34 = vpop.f32.mrb[43].mxu0 }
 0x14f   : > { %v1216_v35 = vadd.f32 %v2155_v33, %v1119_v53  ;;  %v2078_v37 = vadd.f32 %v2077_v34, %v2076_v31  ;;  %v1207_v5 = vpop.f32.mrb[43].mxu1  ;;  %v1124_v38 = vadd.f32 %v2075_v29, %v2783_v22  ;;  %v1269_v42 = vmax.f32 %v1213_v28, 0.0 }
 0x150   : > { %v1208_v41 = vadd.f32 %v1207_v5, %v1111_v36  ;;  %v1267_v44 = vmax.f32 %v1205_v32, 0.0 }
 0x151   : > { %v1270_v7 = vmax.f32 %v1216_v35, 0.0  ;;  %v1127_v43 = vadd.f32 %v2078_v37, %v2785_v23 }
 0x152   : > { %v1268_v45 = vmax.f32 %v1208_v41, 0.0 }
 0x153   : > { %v1284_v46 = vpack.c.bf16 %v1270_v7, %v1269_v42  ;;  %v2079_v47 = vpop.f32.mrb[44].mxu0 }
 0x154   : > { %v1283_v48 = vpack.c.bf16 %v1268_v45, %v1267_v44  ;;  %v2158_v49 = vpop.f32.mrb[44].mxu1  ;;  %v2080_v50 = vpop.f32.mrb[45].mxu0 }
 0x155   : > { %v2081_v52 = vadd.f32 %v2080_v50, %v2079_v47  ;;  %v1220_v54 = vpop.f32.mrb[45].mxu1  ;;  %v2082_v55 = vpop.f32.mrb[46].mxu0 }
 0x156   : > { %v1221_v56 = vadd.f32 %v1220_v54, %v1124_v38  ;;  %v2159_v59 = vpop.f32.mrb[46].mxu1  ;;  %2184 = vmatprep.mubr.bf16.mxu1 %v1283_v48  ;;  %v2083_v60 = vpop.f32.mrb[47].mxu0 }
 0x157   : > { %v1132_v22 = vadd.f32 %v2081_v52, %v2789_v39  ;;  %v2084_v61 = vadd.f32 %v2083_v60, %v2082_v55  ;;  %v1223_v62 = vpop.f32.mrb[47].mxu1  ;;  %2185 = vmatmul.mubr.bf16.vlgmr.msra.gmra.mrb[56].mxu1 %v1284_v46 }
 0x158   : > { %v1224_v23 = vadd.f32 %v1223_v62, %v1127_v43  ;;  %v1271_v1 = vmax.f32 %v1221_v56, 0.0 }
 0x159   : > { %v1229_v63 = vadd.f32 %v2158_v49, %v1132_v22  ;;  %v1135_v0 = vadd.f32 %v2084_v61, %v2791_v40 }
 0x15a   : > { %v1272_v2 = vmax.f32 %v1224_v23, 0.0 }
 0x15b   : > { %v1232_v36 = vadd.f32 %v2159_v59, %v1135_v0  ;;  %v2085_v6 = vpop.f32.mrb[48].mxu0  ;;  %v1273_v13 = vmax.f32 %v1229_v63, 0.0 }
 0x15c   : > { %v1285_v8 = vpack.c.bf16 %v1272_v2, %v1271_v1  ;;  %v2086_v9 = vpop.f32.mrb[49].mxu0  ;;  %v2162_v10 = vpop.f32.mrb[48].mxu1 }
 0x15d   : > { %v1274_v14 = vmax.f32 %v1232_v36, 0.0  ;;  %v2087_v15 = vadd.f32 %v2086_v9, %v2085_v6  ;;  %v2088_v16 = vpop.f32.mrb[50].mxu0  ;;  %v1236_v17 = vpop.f32.mrb[49].mxu1 }
 0x15e   : > { %2188 = vmatprep.mubr.bf16.mxu1 %v1285_v8  ;;  %v2089_v39 = vpop.f32.mrb[51].mxu0  ;;  %v2163_v18 = vpop.f32.mrb[50].mxu1 }
 0x15f   : > { %v2090_v19 = vadd.f32 %v2089_v39, %v2088_v16  ;;  %v1140_v51 = vadd.f32 %v2087_v15, %v2795_v57  ;;  %v1286_v20 = vpack.c.bf16 %v1274_v14, %v1273_v13  ;;  %v1239_v40 = vpop.f32.mrb[51].mxu1 }
 0x161   : > { %v1237_v53 = vadd.f32 %v1236_v17, %v1140_v51  ;;  %2189 = vmatmul.mubr.bf16.gmra.mrb[60].mxu1 %v1286_v20  ;;  %v1143_v25 = vadd.f32 %v2090_v19, %v2797_v58 }
 0x163   : > { %v1240_v26 = vadd.f32 %v1239_v40, %v1143_v25  ;;  %v2091_v27 = vpop.f32.mrb[52].mxu0  ;;  %v1275_v30 = vmax.f32 %v1237_v53, 0.0 }
 0x164   : > { %v2166_v28 = vpop.f32.mrb[52].mxu1  ;;  %v2092_v29 = vpop.f32.mrb[53].mxu0 }
 0x165   : > { %v1276_v31 = vmax.f32 %v1240_v26, 0.0  ;;  %v1261_v32 = vadd.f32 %v2166_v28, %v2816_v21  ;;  %v2093_v33 = vadd.f32 %v2092_v29, %v2091_v27  ;;  %v1252_v34 = vpop.f32.mrb[53].mxu1  ;;  %v2094_v35 = vpop.f32.mrb[54].mxu0 }
 0x166   : > { %v1253_v37 = vadd.f32 %v1252_v34, %v2810_v3  ;;  %v2167_v57 = vpop.f32.mrb[54].mxu1  ;;  %v2095_v5 = vpop.f32.mrb[55].mxu0 }
 0x167   : > { %v1287_v38 = vpack.c.bf16 %v1276_v31, %v1275_v30  ;;  %v1148_v41 = vadd.f32 %v2093_v33, %v2801_v11  ;;  %v1264_v58 = vadd.f32 %v2167_v57, %v2819_v24  ;;  %v1255_v42 = vpop.f32.mrb[55].mxu1  ;;  %v2096_v7 = vadd.f32 %v2095_v5, %v2094_v35  ;;  %v1882_v24 = vld [vmem:[%s2905_s4] ss:$0 sm:$0xff] }
 0x168   : > { %v1256_v43 = vadd.f32 %v1255_v42, %v2813_v4  ;;  %v1281_v44 = vmax.f32 %v1261_v32, 0.0  ;;  %v1279_v21 = vmax.f32 %v1253_v37, 0.0  ;;  %v2320_v4 = vld [vmem:[%s2906_s5 + $0x30] sm:$0xff]  }
 0x169   : > { %v1245_v45 = vadd.f32 %v2162_v10, %v1148_v41  ;;  %v1282_v46 = vmax.f32 %v1264_v58, 0.0  ;;  %2192 = vmatprep.mubr.bf16.mxu1 %v1287_v38  ;;  %v1151_v47 = vadd.f32 %v2096_v7, %v2803_v12  ;;  %2212 = vmatprep.subr.bf16.mxu0 %v2320_v4  ;;  %v2321_v12 = vld [vmem:[%s2906_s5 + $0x38] sm:$0xff]  }
 0x16a   : > { %v1280_v48 = vmax.f32 %v1256_v43, 0.0  ;;  %2213 = vmatpush3.bf16.msra.mxu0 %v2320_v4 }
 0x16b   : > { %v1290_v3 = vpack.c.bf16 %v1282_v46, %v1281_v44  ;;  %v1248_v49 = vadd.f32 %v2163_v18, %v1151_v47  ;;  %v1277_v52 = vmax.f32 %v1245_v45, 0.0  ;;  %2214 = vmatprep.subr.bf16.mxu0 %v2321_v12 }
 0x16c   : > { %v1289_v50 = vpack.c.bf16 %v1280_v48, %v1279_v21 }
 0x16d   : > { %v1278_v54 = vmax.f32 %v1248_v49, 0.0  ;;  %v2842_v49 = vstv %s1499_s11 }
 0x16e   : > { %2215 = vmatpush3.bf16.msra.mxu0 %v2321_v12 }
 0x16f   : > { %v1288_v11 = vpack.c.bf16 %v1278_v54, %v1277_v52 }
 0x171   : > { %2193 = vmatmul.mubr.bf16.gmra.mrb[64].mxu1 %v1288_v11 }
 0x172   : > { %2196 = vmatprep.mubr.bf16.mxu1 %v1289_v50 }
 0x179   : > { %2197 = vmatmul.mubr.bf16.gmra.mrb[68].mxu1 %v1290_v3 }
 0x22a   : > { %v2186_v55 = vpop.f32.mrb[56].mxu1 }
 0x22b   : > { %v1405_v56 = vadd.f32 %v2186_v55, %v1882_v24  ;;  %v1396_v59 = vpop.f32.mrb[57].mxu1 }
 0x22c   : > { %v1397_v60 = vadd.f32 %v1882_v24, %v1396_v59  ;;  %v2187_v22 = vpop.f32.mrb[58].mxu1 }
 0x22d   : > { %v1408_v61 = vadd.f32 %v2187_v22, %v1882_v24  ;;  %v1399_v62 = vpop.f32.mrb[59].mxu1  ;;  %v1461_v63 = vmax.f32 %v1405_v56, 0.0 }
 0x22e   : > { %v1400_v23 = vadd.f32 %v1882_v24, %v1399_v62  ;;  %v1459_v1 = vmax.f32 %v1397_v60, 0.0 }
 0x22f   : > { %v1462_v0 = vmax.f32 %v1408_v61, 0.0 }
 0x230   : > { %v1460_v2 = vmax.f32 %v1400_v23, 0.0 }
 0x231   : > { %v1476_v36 = vpack.c.bf16 %v1462_v0, %v1461_v63 }
 0x232   : > { %v1475_v6 = vpack.c.bf16 %v1460_v2, %v1459_v1 }
 0x234   : > { %2216 = vmatprep.mubr.bf16.mxu0 %v1475_v6  ;;  %v2190_v8 = vpop.f32.mrb[60].mxu1 }
 0x235   : > { %v1421_v9 = vadd.f32 %v2190_v8, %v1882_v24  ;;  %2217 = vmatmul.mubr.bf16.vlgmr.msra.gmra.mrb[56].mxu0 %v1476_v36  ;;  %v1412_v10 = vpop.f32.mrb[61].mxu1 }
 0x236   : > { %v1413_v13 = vadd.f32 %v1882_v24, %v1412_v10  ;;  %v2191_v14 = vpop.f32.mrb[62].mxu1 }
 0x237   : > { %v1424_v15 = vadd.f32 %v2191_v14, %v1882_v24  ;;  %v1415_v16 = vpop.f32.mrb[63].mxu1  ;;  %v1465_v39 = vmax.f32 %v1421_v9, 0.0 }
 0x238   : > { %v1416_v17 = vadd.f32 %v1882_v24, %v1415_v16  ;;  %v1463_v19 = vmax.f32 %v1413_v13, 0.0 }
 0x239   : > { %v1466_v18 = vmax.f32 %v1424_v15, 0.0 }
 0x23a   : > { %v1464_v51 = vmax.f32 %v1416_v17, 0.0 }
 0x23b   : > { %v1478_v20 = vpack.c.bf16 %v1466_v18, %v1465_v39 }
 0x23c   : > { %v1477_v40 = vpack.c.bf16 %v1464_v51, %v1463_v19 }
 0x23e   : > { %2220 = vmatprep.mubr.bf16.mxu0 %v1477_v40 }
 0x23f   : > { %2221 = vmatmul.mubr.bf16.gmra.mrb[60].mxu0 %v1478_v20 }
 0x244   : > { %v2194_v53 = vpop.f32.mrb[64].mxu1 }
 0x245   : > { %v1437_v25 = vadd.f32 %v2194_v53, %v1882_v24  ;;  %v1428_v26 = vpop.f32.mrb[65].mxu1 }
 0x246   : > { %v1429_v27 = vadd.f32 %v1882_v24, %v1428_v26  ;;  %v2195_v28 = vpop.f32.mrb[66].mxu1 }
 0x247   : > { %v1440_v29 = vadd.f32 %v2195_v28, %v1882_v24  ;;  %v1431_v30 = vpop.f32.mrb[67].mxu1  ;;  %v1469_v32 = vmax.f32 %v1437_v25, 0.0 }
 0x248   : > { %v1432_v31 = vadd.f32 %v1882_v24, %v1431_v30  ;;  %v1467_v34 = vmax.f32 %v1429_v27, 0.0 }
 0x249   : > { %v1470_v33 = vmax.f32 %v1440_v29, 0.0 }
 0x24a   : > { %v1468_v35 = vmax.f32 %v1432_v31, 0.0 }
 0x24b   : > { %v1480_v37 = vpack.c.bf16 %v1470_v33, %v1469_v32 }
 0x24c   : > { %v1479_v57 = vpack.c.bf16 %v1468_v35, %v1467_v34  ;;  %v2198_v5 = vpop.f32.mrb[68].mxu1 }
 0x24d   : > { %v1453_v38 = vadd.f32 %v2198_v5, %v1882_v24  ;;  %v1444_v41 = vpop.f32.mrb[69].mxu1 }
 0x24e   : > { %v1445_v58 = vadd.f32 %v1882_v24, %v1444_v41  ;;  %v2199_v42 = vpop.f32.mrb[70].mxu1  ;;  %2224 = vmatprep.mubr.bf16.mxu0 %v1479_v57 }
 0x24f   : > { %v1456_v7 = vadd.f32 %v2199_v42, %v1882_v24  ;;  %v1447_v43 = vpop.f32.mrb[71].mxu1  ;;  %2225 = vmatmul.mubr.bf16.gmra.mrb[64].mxu0 %v1480_v37  ;;  %v1473_v45 = vmax.f32 %v1453_v38, 0.0 }
 0x250   : > { %v1448_v44 = vadd.f32 %v1882_v24, %v1447_v43  ;;  %v1471_v21 = vmax.f32 %v1445_v58, 0.0 }
 0x251   : > { %v1474_v46 = vmax.f32 %v1456_v7, 0.0 }
 0x252   : > { %v1472_v47 = vmax.f32 %v1448_v44, 0.0 }
 0x253   : > { %v1482_v48 = vpack.c.bf16 %v1474_v46, %v1473_v45 }
 0x254   : > { %v1481_v3 = vpack.c.bf16 %v1472_v47, %v1471_v21 }
 0x256   : > { %2228 = vmatprep.mubr.bf16.mxu0 %v1481_v3 }
 0x257   : > { %2229 = vmatmul.mubr.bf16.gmra.mrb[68].mxu0 %v1482_v48 }
 0x308   : > { %v2218_v50 = vpop.f32.mrb[56].mxu0 }
 0x309   : > { %v1592_v52 = vadd.f32 %v2218_v50, %v2842_v49  ;;  %v1583_v54 = vpop.f32.mrb[57].mxu0 }
 0x30a   : > { %v1584_v11 = vadd.f32 %v1583_v54, %v2842_v49  ;;  %v2219_v4 = vpop.f32.mrb[58].mxu0 }
 0x30b   : > { %v1901_v12 = vmul.f32 -1.442695, %v1592_v52  ;;  %v1595_v24 = vadd.f32 %v2219_v4, %v2842_v49  ;;  %v1586_v55 = vpop.f32.mrb[59].mxu0 }
 0x30c   : > { %v1899_v56 = vmul.f32 -1.442695, %v1584_v11  ;;  %v1587_v59 = vadd.f32 %v1586_v55, %v2842_v49 }
 0x30d   : > { %2322 = vpow2.f32 %v1901_v12  ;;  %v1902_v60 = vmul.f32 -1.442695, %v1595_v24 }
 0x30e   : > { %2324 = vpow2.f32 %v1899_v56  ;;  %v1900_v22 = vmul.f32 -1.442695, %v1587_v59 }
 0x30f   : > { %2326 = vpow2.f32 %v1902_v60 }
 0x310   : > { %2328 = vpow2.f32 %v1900_v22 }
 0x312   : > { %v2222_v61 = vpop.f32.mrb[60].mxu0 }
 0x313   : > { %v1608_v62 = vadd.f32 %v2222_v61, %v2842_v49  ;;  %v1599_v23 = vpop.f32.mrb[61].mxu0 }
 0x314   : > { %v1600_v63 = vadd.f32 %v1599_v23, %v2842_v49  ;;  %v2223_v0 = vpop.f32.mrb[62].mxu0 }
 0x315   : > { %v1905_v1 = vmul.f32 -1.442695, %v1608_v62  ;;  %v1611_v2 = vadd.f32 %v2223_v0, %v2842_v49  ;;  %v1602_v36 = vpop.f32.mrb[63].mxu0 }
 0x316   : > { %v1903_v6 = vmul.f32 -1.442695, %v1600_v63  ;;  %v1603_v8 = vadd.f32 %v1602_v36, %v2842_v49 }
 0x317   : > { %v2323_v9 = vpop.eup %2322  ;;  %2330 = vpow2.f32 %v1905_v1  ;;  %v1906_v10 = vmul.f32 -1.442695, %v1611_v2 }
 0x318   : > { %v2325_v13 = vpop.eup %2324  ;;  %v1696_v14 = vadd.f32 1.0, %v2323_v9  ;;  %2332 = vpow2.f32 %v1903_v6  ;;  %v1904_v18 = vmul.f32 -1.442695, %v1603_v8 }
 0x319   : > { %v2327_v15 = vpop.eup %2326  ;;  %v1694_v16 = vadd.f32 1.0, %v2325_v13  ;;  %2334 = vpow2.f32 %v1906_v10 }
 0x31a   : > { %v2329_v17 = vpop.eup %2328  ;;  %2336 = vrcp.f32 %v1696_v14  ;;  %v1697_v39 = vadd.f32 1.0, %v2327_v15 }
 0x31b   : > { %2338 = vrcp.f32 %v1694_v16  ;;  %v1695_v19 = vadd.f32 1.0, %v2329_v17 }
 0x31c   : > { %2340 = vrcp.f32 %v1697_v39 }
 0x31d   : > { %2342 = vrcp.f32 %v1695_v19 }
 0x31e   : > { %2344 = vpow2.f32 %v1904_v18 }
 0x321   : > { %v2331_v51 = vpop.eup %2330 }
 0x322   : > { %v2333_v20 = vpop.eup %2332  ;;  %v1700_v40 = vadd.f32 1.0, %v2331_v51  ;;  %v2226_v26 = vpop.f32.mrb[64].mxu0 }
 0x323   : > { %v2335_v53 = vpop.eup %2334  ;;  %v1698_v25 = vadd.f32 1.0, %v2333_v20  ;;  %v1624_v29 = vadd.f32 %v2226_v26, %v2842_v49  ;;  %v1615_v30 = vpop.f32.mrb[65].mxu0 }
 0x324   : > { %v2337_v27 = vpop.eup %2336  ;;  %2346 = vrcp.f32 %v1700_v40  ;;  %v1701_v28 = vadd.f32 1.0, %v2335_v53  ;;  %v1616_v32 = vadd.f32 %v1615_v30, %v2842_v49  ;;  %v2227_v33 = vpop.f32.mrb[66].mxu0 }
 0x325   : > { %v2339_v31 = vpop.eup %2338  ;;  %1745 = vst.msk [vmem:[%s2856_s16 + $0x10] sm:$0xff] %vm1742_vm1, %v2337_v27  ;;  %2348 = vrcp.f32 %v1698_v25  ;;  %v1909_v35 = vmul.f32 -1.442695, %v1624_v29  ;;  %v1627_v37 = vadd.f32 %v2227_v33, %v2842_v49  ;;  %v1618_v57 = vpop.f32.mrb[67].mxu0 }
 0x326   : > { %v2341_v34 = vpop.eup %2340  ;;  %1743 = vst.msk [vmem:[%s2856_s16] sm:$0xff] %vm1742_vm1, %v2339_v31  ;;  %2350 = vrcp.f32 %v1701_v28  ;;  %v1907_v38 = vmul.f32 -1.442695, %v1616_v32  ;;  %v1619_v41 = vadd.f32 %v1618_v57, %v2842_v49 }
 0x327   : > { %v2343_v5 = vpop.eup %2342  ;;  %1746 = vst.msk [vmem:[%s2856_s16 + $0x18] sm:$0xff] %vm1742_vm1, %v2341_v34  ;;  %2352 = vpow2.f32 %v1909_v35  ;;  %v1910_v42 = vmul.f32 -1.442695, %v1627_v37 }
 0x328   : > { %v2345_v58 = vpop.eup %2344  ;;  %1744 = vst.msk [vmem:[%s2856_s16 + $0x8] sm:$0xff] %vm1742_vm1, %v2343_v5  ;;  %2354 = vpow2.f32 %v1907_v38  ;;  %v1908_v43 = vmul.f32 -1.442695, %v1619_v41 }
 0x329   : > { %v1699_v7 = vadd.f32 1.0, %v2345_v58  ;;  %2356 = vpow2.f32 %v1910_v42 }
 0x32a   : > { %v2230_v44 = vpop.f32.mrb[68].mxu0 }
 0x32b   : > { %2358 = vrcp.f32 %v1699_v7  ;;  %v1640_v45 = vadd.f32 %v2230_v44, %v2842_v49  ;;  %v1631_v46 = vpop.f32.mrb[69].mxu0 }
 0x32c   : > { %2360 = vpow2.f32 %v1908_v43  ;;  %v1632_v21 = vadd.f32 %v1631_v46, %v2842_v49  ;;  %v2231_v47 = vpop.f32.mrb[70].mxu0 }
 0x32d   : > { %v1913_v3 = vmul.f32 -1.442695, %v1640_v45  ;;  %v1643_v50 = vadd.f32 %v2231_v47, %v2842_v49  ;;  %v1634_v52 = vpop.f32.mrb[71].mxu0 }
 0x32e   : > { %v2347_v48 = vpop.eup %2346  ;;  %v1911_v11 = vmul.f32 -1.442695, %v1632_v21  ;;  %v1635_v4 = vadd.f32 %v1634_v52, %v2842_v49 }
 0x32f   : > { %v2349_v54 = vpop.eup %2348  ;;  %1749 = vst.msk [vmem:[%s2856_s16 + $0x30] sm:$0xff] %vm1742_vm1, %v2347_v48  ;;  %2362 = vpow2.f32 %v1913_v3  ;;  %v1914_v24 = vmul.f32 -1.442695, %v1643_v50 }
 0x330   : > { %v2351_v12 = vpop.eup %2350  ;;  %1747 = vst.msk [vmem:[%s2856_s16 + $0x20] sm:$0xff] %vm1742_vm1, %v2349_v54  ;;  %2364 = vpow2.f32 %v1911_v11  ;;  %v1912_v55 = vmul.f32 -1.442695, %v1635_v4 }
 0x331   : > { %1750 = vst.msk [vmem:[%s2856_s16 + $0x38] sm:$0xff] %vm1742_vm1, %v2351_v12  ;;  %v2353_v56 = vpop.eup %2352  ;;  %2366 = vpow2.f32 %v1914_v24 }
 0x332   : > { %v2355_v59 = vpop.eup %2354  ;;  %v1704_v60 = vadd.f32 1.0, %v2353_v56  ;;  %2368 = vpow2.f32 %v1912_v55 }
 0x333   : > { %v2357_v22 = vpop.eup %2356  ;;  %v1702_v61 = vadd.f32 1.0, %v2355_v59 }
 0x334   : > { %2370 = vrcp.f32 %v1704_v60  ;;  %v1705_v49 = vadd.f32 1.0, %v2357_v22 }
 0x335   : > { %v2359_v62 = vpop.eup %2358  ;;  %2372 = vrcp.f32 %v1702_v61 }
 0x336   : > { %v2361_v23 = vpop.eup %2360  ;;  %1748 = vst.msk [vmem:[%s2856_s16 + $0x28] sm:$0xff] %vm1742_vm1, %v2359_v62  ;;  %2374 = vrcp.f32 %v1705_v49 }
 0x337   : > { %v1703_v63 = vadd.f32 1.0, %v2361_v23 }
 0x339   : > { %2376 = vrcp.f32 %v1703_v63  ;;  %v2363_v0 = vpop.eup %2362 }
 0x33a   : > { %v2365_v1 = vpop.eup %2364  ;;  %v1708_v2 = vadd.f32 1.0, %v2363_v0 }
 0x33b   : > { %v2367_v36 = vpop.eup %2366  ;;  %v1706_v6 = vadd.f32 1.0, %v2365_v1 }
 0x33c   : > { %v2369_v8 = vpop.eup %2368  ;;  %2378 = vrcp.f32 %v1708_v2  ;;  %v1709_v9 = vadd.f32 1.0, %v2367_v36 }
 0x33d   : > { %2380 = vrcp.f32 %v1706_v6  ;;  %v1707_v10 = vadd.f32 1.0, %v2369_v8 }
 0x33e   : > { %v2371_v13 = vpop.eup %2370  ;;  %2382 = vrcp.f32 %v1709_v9 }
 0x33f   : > { %v2373_v14 = vpop.eup %2372  ;;  %1753 = vst.msk [vmem:[%s2856_s16 + $0x50] sm:$0xff] %vm1742_vm1, %v2371_v13  ;;  %2384 = vrcp.f32 %v1707_v10 }
 0x340   : > { %v2375_v15 = vpop.eup %2374  ;;  %1751 = vst.msk [vmem:[%s2856_s16 + $0x40] sm:$0xff] %vm1742_vm1, %v2373_v14 }
 0x341   : > { %1754 = vst.msk [vmem:[%s2856_s16 + $0x58] sm:$0xff] %vm1742_vm1, %v2375_v15 }
 0x343   : > { %v2377_v16 = vpop.eup %2376 }
 0x344   : > { %1752 = vst.msk [vmem:[%s2856_s16 + $0x48] sm:$0xff] %vm1742_vm1, %v2377_v16 }
 0x346   : > { %v2379_v17 = vpop.eup %2378 }
 0x347   : > { %v2381_v39 = vpop.eup %2380  ;;  %1757 = vst.msk [vmem:[%s2856_s16 + $0x70] sm:$0xff] %vm1742_vm1, %v2379_v17 }
 0x348   : > { %v2383_v18 = vpop.eup %2382  ;;  %1755 = vst.msk [vmem:[%s2856_s16 + $0x60] sm:$0xff] %vm1742_vm1, %v2381_v39 }
 0x349   : > { %v2385_v19 = vpop.eup %2384  ;;  %1758 = vst.msk [vmem:[%s2856_s16 + $0x78] sm:$0xff] %vm1742_vm1, %v2383_v18 }
 0x34a   : > { %1756 = vst.msk [vmem:[%s2856_s16 + $0x68] sm:$0xff] %vm1742_vm1, %v2385_v19 }
 0x34b PF: > { %s18_s26 = sadd.s32 1, %s2392_s26  }
 0x34c   : > { %p15_p4 = scmp.ge.s32.totalorder %s18_s26, 4  }
 0x34e   :  { %17 = sbr.rel (!%p15_p4) target bundleno = 2 (0x2), region = 78 }

</bundles_post_ra>
